<compile_context>
chip_gen: v5e
topology: v5e:2x2
jax: 0.10.0
libtpu: 0.0.40
codegen_flags: <defaults>
</compile_context>

<pallas_src>
import math

import jax
import jax.numpy as jnp
from jax.experimental import pallas as pl
from jax.experimental.pallas import tpu as pltpu


def _round_up(n, m):
    return ((n + m - 1) // m) * m


def _sublane(itemsize):
    # Native sublane granularity: 8 rows for 4-byte dtypes, 16 for 2-byte,
    # 32 for 1-byte (sub-32-bit dtypes pack along sublanes).
    return max(8, 32 // max(1, int(itemsize)))


def _nfm_forward_kernel(x_ref, p_ref, params_ref, z_ref, plp_ref):
    """One batch tile of the fused NormalizingFlowModel.forward.

    x_ref     : (TB, D)  activation tile
    p_ref     : (D, D)   one-hot permutation matrix, bf16, VMEM-resident
    params_ref: (8, D)   rows [exp(s1), t1, exp(s2), t2, pad...] (f32)
    z_ref     : (TB, D)  transformed sample z
    plp_ref   : (TB, 1)  prior log-prob under N(0, I)
    """
    d = x_ref.shape[1]
    x = x_ref[...].astype(jnp.float32)
    params = params_ref[...].astype(jnp.float32)
    e1 = params[0:1, :]   # exp(s1)
    t1 = params[1:2, :]
    e2 = params[2:3, :]   # exp(s2)
    t2 = params[3:4, :]

    # Flow 0: AffineConstantFlow  h = x * exp(s1) + t1   (log|det| = sum(s1), constant)
    h = x * e1 + t1

    # Flow 1: InvertiblePermutation  h[:, j] = h[:, perm[j]], expressed as an
    # MXU matmul against the resident one-hot matrix P (P[i, j] = 1 iff
    # i == perm[j]).  P is exact in bf16; splitting the f32 LHS into 3 bf16
    # chunks reconstructs the f32 permutation to ~1 ulp using 3 native bf16
    # MXU passes (vs 6 passes of precision=HIGHEST f32xf32 emulation).
    p = p_ref[...]
    c0 = h.astype(jnp.bfloat16)
    r1 = h - c0.astype(jnp.float32)
    c1 = r1.astype(jnp.bfloat16)
    c2 = (r1 - c1.astype(jnp.float32)).astype(jnp.bfloat16)
    h = (jnp.dot(c0, p, preferred_element_type=jnp.float32)
         + jnp.dot(c1, p, preferred_element_type=jnp.float32)
         + jnp.dot(c2, p, preferred_element_type=jnp.float32))

    # Flow 2: AffineConstantFlow
    z = h * e2 + t2
    z_ref[...] = z.astype(z_ref.dtype)

    # Prior: standard MultivariateNormal(0, I) log-prob (lane-dense reduce).
    plp = (-0.5 * jnp.sum(z * z, axis=-1, keepdims=True)
           - 0.5 * d * math.log(2.0 * math.pi))
    plp_ref[...] = plp.astype(plp_ref.dtype)


class NormalizingFlowModel:
    """JAX/Pallas port of NormalizingFlowModel.forward with a fixed flow stack."""

    def __init__(self, dim, key, tile_b=1024):
        k1, k2, k3, k4, k5 = jax.random.split(key, 5)
        self.dim = dim
        # AffineConstantFlow #0 parameters.
        self.s1 = 0.1 * jax.random.normal(k1, (1, dim), jnp.float32)
        self.t1 = 0.1 * jax.random.normal(k2, (1, dim), jnp.float32)
        # InvertiblePermutation parameter (torch.randperm analogue).
        self.perm = jax.random.permutation(k3, jnp.arange(dim, dtype=jnp.int32))
        # AffineConstantFlow #1 parameters.
        self.s2 = 0.1 * jax.random.normal(k4, (1, dim), jnp.float32)
        self.t2 = 0.1 * jax.random.normal(k5, (1, dim), jnp.float32)

        # One-hot permutation matrix, built ONCE (registered-buffer analogue):
        # P[i, j] = 1 iff i == perm[j]  =>  (x @ P)[:, j] = x[:, perm[j]].
        # Stored in bf16 (0/1 exact) -> half the VMEM/DMA footprint of f32.
        self.p_onehot = (jnp.arange(dim, dtype=jnp.int32)[:, None]
                         == self.perm[None, :]).astype(jnp.bfloat16)

        # Parameters stacked into one sublane-aligned (8, D) array:
        # rows [exp(s1), t1, exp(s2), t2, 0, 0, 0, 0].  exp() hoisted to init.
        self.params = jnp.concatenate(
            [jnp.exp(self.s1), self.t1, jnp.exp(self.s2), self.t2,
             jnp.zeros((4, dim), jnp.float32)], axis=0)

        # Constant log-det of the whole stack (permutation contributes 0).
        self.log_det_const = jnp.sum(self.s1) + jnp.sum(self.s2)

        self.tile_b = max(8, int(tile_b))

    # ---- pure-JAX reference (also the small-D fallback path) ---------------
    def _forward_reference(self, x):
        h = x.astype(jnp.float32) * jnp.exp(self.s1) + self.t1
        h = h[:, self.perm]
        z = h * jnp.exp(self.s2) + self.t2
        plp = (-0.5 * jnp.sum(z * z, axis=-1)
               - 0.5 * self.dim * math.log(2.0 * math.pi))
        ld = jnp.broadcast_to(self.log_det_const, (x.shape[0],)).astype(jnp.float32)
        return z.astype(x.dtype), plp, ld

    # ---- tile selection ------------------------------------------------------
    def _pick_tile_b(self, m, d, itemsize):
        sub = _sublane(itemsize)
        tile = _round_up(max(self.tile_b, sub), sub)
        # VMEM budget: double-buffered x and z tiles + double-buffered bf16 P
        # must stay well inside the smallest default scoped VMEM (v5e: 16 MiB,
        # v7x: 32 MiB of 64 MiB physical).
        p_bytes = 2 * d * d * 2                       # double-buffered bf16 P
        budget = 12 * 1024 * 1024 - p_bytes
        bytes_per_row = 2 * 2 * d * itemsize          # x + z, double-buffered
        tile = min(tile, max(sub, (budget // bytes_per_row) // sub * sub))
        # v7x: keep >= ~8 grid steps so both TensorCores get work and the
        # prefetch/writeback pipeline stays full (v5e/v6e: pipelining depth).
        tile = min(tile, _round_up(pl.cdiv(m, 8), sub))
        # Never exceed the (sublane-rounded) batch itself.
        tile = max(sub, min(tile, _round_up(m, sub)))
        return tile

    # ---- fused Pallas forward ------------------------------------------------
    def forward(self, x, context=None):
        del context
        m, d = x.shape
        assert d == self.dim

        # Constant log-det: computed once in the wrapper instead of emitting a
        # (TB, 1) lane-width-1 masked-store stream per tile from the kernel.
        log_det = jnp.broadcast_to(self.log_det_const, (m,)).astype(jnp.float32)

        if d % 128 != 0:
            # Lane-sparse feature dim: plain XLA gather beats an under-occupied
            # Pallas matmul with masked partial stores here.
            z, plp, _ = self._forward_reference(x)
            return z, plp, log_det

        # TODO(synk): for large D (>~512 on v5e, >~1-2k on v6e/v7x) the dense
        # O(B*D^2) one-hot matmul flips the kernel from HBM-bound to MXU/VMEM
        # bound; switch to a block-structured permutation (scalar-prefetched
        # 128-lane-group table in the x/z index_map + per-group 128x128 one-hot
        # matmuls) and single-buffer P (pipeline_mode=pl.Buffered(1)).

        itemsize = jnp.dtype(x.dtype).itemsize
        tile_b = self._pick_tile_b(m, d, itemsize)

        # No full-array padding: grid uses cdiv and Pallas masks the tail block
        # (padded output rows are never read back).
        grid = (pl.cdiv(m, tile_b),)

        out_shape = (
            jax.ShapeDtypeStruct((m, d), x.dtype),       # z
            jax.ShapeDtypeStruct((m, 1), jnp.float32),   # prior log-prob
        )
        grid_spec = pltpu.PrefetchScalarGridSpec(
            num_scalar_prefetch=0,
            grid=grid,
            in_specs=[
                pl.BlockSpec((tile_b, d), lambda i: (i, 0)),   # x tile
                pl.BlockSpec((d, d), lambda i: (0, 0)),        # P (VMEM resident)
                pl.BlockSpec((8, d), lambda i: (0, 0)),        # stacked params
            ],
            out_specs=(
                pl.BlockSpec((tile_b, d), lambda i: (i, 0)),   # z
                pl.BlockSpec((tile_b, 1), lambda i: (i, 0)),   # prior log-prob
            ),
        )
        z, plp = pl.pallas_call(
            _nfm_forward_kernel,
            out_shape=out_shape,
            grid_spec=grid_spec,
            compiler_params=pltpu.CompilerParams(
                # Batch tiles are independent -> shard across both TCs on v7x.
                dimension_semantics=("parallel",)),
        )(x, self.p_onehot, self.params)

        return z, plp[:, 0], log_det


if __name__ == "__main__":
    # Small but lane-dense shapes: D = 128 keeps stores unmasked and the MXU
    # occupied; B = 12 with the default tile policy yields tile_b = 8 and a
    # grid of 2 steps, exercising the pipelined multi-tile path plus the
    # masked (non-divisible) tail block.
    batch, dim = 12, 128
    key = jax.random.PRNGKey(0)
    k_model, k_x = jax.random.split(key)

    model = NormalizingFlowModel(dim, k_model)
    x = jax.random.normal(k_x, (batch, dim), dtype=jnp.float32)

    z, prior_logprob, log_det = model.forward(x)
    z = jax.block_until_ready(z)

    z_ref, plp_ref, ld_ref = model._forward_reference(x)
    assert z.shape == (batch, dim) and z.dtype == x.dtype
    assert prior_logprob.shape == (batch,)
    assert log_det.shape == (batch,)
    assert jnp.allclose(z, z_ref, rtol=1e-5, atol=1e-5), "z mismatch"
    assert jnp.allclose(prior_logprob, plp_ref, rtol=1e-5, atol=1e-5), "prior_logprob mismatch"
    assert jnp.allclose(log_det, ld_ref, rtol=1e-5, atol=1e-5), "log_det mismatch"

    print("KERNEL_OK")
</pallas_src>

<mosaic_0001>
module attributes {stable_mosaic.version = 11 : i64} {
  func.func @_nfm_forward_kernel(%arg0: i32, %arg1: memref<8x128xf32, #tpu.memory_space<vmem>>, %arg2: memref<128x128xbf16, #tpu.memory_space<vmem>>, %arg3: memref<8x128xf32, #tpu.memory_space<vmem>>, %arg4: memref<8x128xf32, #tpu.memory_space<vmem>>, %arg5: memref<8x1xf32, #tpu.memory_space<vmem>>) attributes {dimension_semantics = [#tpu.dimension_semantics<parallel>], iteration_bounds = array<i64: 2>, scalar_prefetch = 0 : i64, scratch_operands = 0 : i64, tpu.core_type = #tpu.core_type<tc>, window_params = [{transform_indices = @transform_0, window_bounds = array<i64: 8, 128>}, {pipeline_mode = #tpu.pipeline_mode<synchronous>, transform_indices = @transform_1, window_bounds = array<i64: 128, 128>}, {pipeline_mode = #tpu.pipeline_mode<synchronous>, transform_indices = @transform_2, window_bounds = array<i64: 8, 128>}, {transform_indices = @transform_3, window_bounds = array<i64: 8, 128>}, {transform_indices = @transform_4, window_bounds = array<i64: 8, 1>}]} {
    %c0 = arith.constant 0 : index
    %c0_0 = arith.constant 0 : index
    %0 = vector.load %arg1[%c0, %c0_0] : memref<8x128xf32, #tpu.memory_space<vmem>>, vector<8x128xf32>
    %c0_1 = arith.constant 0 : index
    %c0_2 = arith.constant 0 : index
    %1 = vector.load %arg3[%c0_1, %c0_2] : memref<8x128xf32, #tpu.memory_space<vmem>>, vector<8x128xf32>
    %2 = vector.extract_strided_slice %1 {offsets = [0, 0], sizes = [1, 128], strides = [1, 1]} : vector<8x128xf32> to vector<1x128xf32>
    %3 = vector.extract_strided_slice %1 {offsets = [1, 0], sizes = [1, 128], strides = [1, 1]} : vector<8x128xf32> to vector<1x128xf32>
    %4 = vector.extract_strided_slice %1 {offsets = [2, 0], sizes = [1, 128], strides = [1, 1]} : vector<8x128xf32> to vector<1x128xf32>
    %5 = vector.extract_strided_slice %1 {offsets = [3, 0], sizes = [1, 128], strides = [1, 1]} : vector<8x128xf32> to vector<1x128xf32>
    %6 = vector.broadcast %2 : vector<1x128xf32> to vector<8x128xf32>
    %7 = arith.mulf %0, %6 : vector<8x128xf32>
    %8 = vector.broadcast %3 : vector<1x128xf32> to vector<8x128xf32>
    %9 = arith.addf %7, %8 : vector<8x128xf32>
    %c0_3 = arith.constant 0 : index
    %c0_4 = arith.constant 0 : index
    %10 = vector.load %arg2[%c0_3, %c0_4] : memref<128x128xbf16, #tpu.memory_space<vmem>>, vector<128x128xbf16>
    %11 = arith.truncf %9 : vector<8x128xf32> to vector<8x128xbf16>
    %12 = arith.extf %11 : vector<8x128xbf16> to vector<8x128xf32>
    %13 = arith.subf %9, %12 : vector<8x128xf32>
    %14 = arith.truncf %13 : vector<8x128xf32> to vector<8x128xbf16>
    %15 = arith.extf %14 : vector<8x128xbf16> to vector<8x128xf32>
    %16 = arith.subf %13, %15 : vector<8x128xf32>
    %17 = arith.truncf %16 : vector<8x128xf32> to vector<8x128xbf16>
    %cst = arith.constant dense<0.000000e+00> : vector<8x128xf32>
    %18 = tpu.matmul %11, %10, %cst {dimension_numbers = #tpu.dot_dimension_numbers<[1], [0], [0], [1], [0, 0, 1, 1], [], []>} : vector<8x128xbf16>, vector<128x128xbf16>, vector<8x128xf32> -> vector<8x128xf32>
    %cst_5 = arith.constant dense<0.000000e+00> : vector<8x128xf32>
    %19 = tpu.matmul %14, %10, %cst_5 {dimension_numbers = #tpu.dot_dimension_numbers<[1], [0], [0], [1], [0, 0, 1, 1], [], []>} : vector<8x128xbf16>, vector<128x128xbf16>, vector<8x128xf32> -> vector<8x128xf32>
    %20 = arith.addf %18, %19 : vector<8x128xf32>
    %cst_6 = arith.constant dense<0.000000e+00> : vector<8x128xf32>
    %21 = tpu.matmul %17, %10, %cst_6 {dimension_numbers = #tpu.dot_dimension_numbers<[1], [0], [0], [1], [0, 0, 1, 1], [], []>} : vector<8x128xbf16>, vector<128x128xbf16>, vector<8x128xf32> -> vector<8x128xf32>
    %22 = arith.addf %20, %21 : vector<8x128xf32>
    %23 = vector.broadcast %4 : vector<1x128xf32> to vector<8x128xf32>
    %24 = arith.mulf %22, %23 : vector<8x128xf32>
    %25 = vector.broadcast %5 : vector<1x128xf32> to vector<8x128xf32>
    %26 = arith.addf %24, %25 : vector<8x128xf32>
    %c0_7 = arith.constant 0 : index
    %c0_8 = arith.constant 0 : index
    %27 = vector.load %arg4[%c0_7, %c0_8] : memref<8x128xf32, #tpu.memory_space<vmem>>, vector<8x128xf32>
    tpu.vector_store %arg4[%c0_7, %c0_8], %26 {strides = array<i32>} : memref<8x128xf32, #tpu.memory_space<vmem>>, vector<8x128xf32>,
    %28 = arith.mulf %26, %26 : vector<8x128xf32>
    %cst_9 = arith.constant dense<0.000000e+00> : vector<8xf32>
    %29 = vector.multi_reduction <add>, %28, %cst_9 [1] : vector<8x128xf32> to vector<8xf32>
    %30 = vector.shape_cast %29 : vector<8xf32> to vector<8x1xf32>
    %cst_10 = arith.constant -5.000000e-01 : f32
    %31 = vector.broadcast %cst_10 : f32 to vector<8x1xf32>
    %32 = arith.mulf %31, %30 : vector<8x1xf32>
    %cst_11 = arith.constant 117.62413 : f32
    %33 = vector.broadcast %cst_11 : f32 to vector<8x1xf32>
    %34 = arith.subf %32, %33 : vector<8x1xf32>
    %c0_12 = arith.constant 0 : index
    %c0_13 = arith.constant 0 : index
    %35 = vector.load %arg5[%c0_12, %c0_13] : memref<8x1xf32, #tpu.memory_space<vmem>>, vector<8x1xf32>
    tpu.vector_store %arg5[%c0_12, %c0_13], %34 {strides = array<i32>} : memref<8x1xf32, #tpu.memory_space<vmem>>, vector<8x1xf32>,
    return
  }
  func.func @transform_0(%arg0: i32) -> (i32, i32) {
    %c0_i32 = arith.constant 0 : i32
    %c0_i32_0 = arith.constant 0 : i32
    return %arg0, %c0_i32 : i32, i32
  }
  func.func @transform_1(%arg0: i32) -> (i32, i32) {
    %c0_i32 = arith.constant 0 : i32
    %c0_i32_0 = arith.constant 0 : i32
    %c0_i32_1 = arith.constant 0 : i32
    return %c0_i32, %c0_i32_0 : i32, i32
  }
  func.func @transform_2(%arg0: i32) -> (i32, i32) {
    %c0_i32 = arith.constant 0 : i32
    %c0_i32_0 = arith.constant 0 : i32
    %c0_i32_1 = arith.constant 0 : i32
    return %c0_i32, %c0_i32_0 : i32, i32
  }
  func.func @transform_3(%arg0: i32) -> (i32, i32) {
    %c0_i32 = arith.constant 0 : i32
    %c0_i32_0 = arith.constant 0 : i32
    return %arg0, %c0_i32 : i32, i32
  }
  func.func @transform_4(%arg0: i32) -> (i32, i32) {
    %c0_i32 = arith.constant 0 : i32
    %c0_i32_0 = arith.constant 0 : i32
    return %arg0, %c0_i32 : i32, i32
  }
}

</mosaic_0001>

<bundles_post_ra>
// kernel: tpu_custom_call.1
= control target key start
LH: loop header
LB: loop body
LE: loop exit
PB: predicated region body
PF: predicated region fallthrough
CT: control target
= control target key end

     0   :  { %10 = vsyncpa [#allocation3], 0  ;;  %s994_s0 = inlined_call_operand.hbm [shape: f32[12,128], index: 0, kind: input, shape index: {}]   ;;  %s995_s1 = inlined_call_operand.hbm [shape: bf16[128,128], index: 1, kind: input, shape index: {}]   ;;  %s996_s2 = inlined_call_operand.hbm [shape: f32[8,128], index: 2, kind: input, shape index: {}]   ;;  %s997_s3 = inlined_call_operand.hbm [shape: f32[12,128], index: 3, kind: output, shape index: {0}]   ;;  %s998_s4 = inlined_call_operand.vmem [shape: f32[12,1], index: 4, kind: output, shape index: {1}]  }
   0x1   :  { %12 = vsyncpa [#allocation3 + $0x1], 0 }
   0x2   :  { %13 = vsyncpa [#allocation6], 0 }
   0x3   :  { %14 = vsyncpa [#allocation4], 0 }
   0x4   :  { %16 = vsyncpa [#allocation4 + $0x1], 0  ;;  %s840_s15 = smov 0   ;;  %s842_s16 = smov 0  }
   0x5   :  { %s844_s17 = smov 0   ;;  %s846_s18 = smov 0  }
   0x6 LB: > { %s158_s21 = sshll.u32 %s995_s1, 4  ;;  %s864_s22 = sadd.s32 4294967295, %s809_s18   ;;  %s809_s18 = sphi %s846_s18, %s1009_s18   ;;  %s805_s17 = sphi %s844_s17, %s1008_s17   ;;  %s801_s16 = sphi %s842_s16, %s1007_s16   ;;  %s797_s15 = sphi %s840_s15, %s1006_s15   ;;  %s159_s21 = int_to_ptr.hbm [resolvable:$true] %s158_s21 }
   0x7   : > { %p523_p0 = scmp.ge.s32.totalorder %s809_s18, 1  ;;  %p43_p1 = scmp.eq.s32.totalorder %s864_s22, 0 }
   0x8   : > { %p147_p2 = scmp.lt.s32.totalorder %s809_s18, 3  ;;  %s811_s24 = smov [#allocation5]  }
   0x9   : > { %s160_s25 = sshll.u32 %s811_s24, 4  ;;  %s173_s28 = sshll.u32 %s996_s2, 4  ;;  %s161_s25 = int_to_ptr.vmem [resolvable:$true] %s160_s25  ;;  %s174_s28 = int_to_ptr.hbm [resolvable:$true] %s173_s28 }
   0xa   : > { %p869_p3 = pnand %p523_p0, %p147_p2  ;;  %s812_s29 = smov [#allocation7]  }
   0xb   : > { %s175_s30 = sshll.u32 %s812_s29, 4  ;;  %s813_s5 = smov 64   ;;  %s176_s30 = int_to_ptr.vmem [resolvable:$true] %s175_s30 }
   0xc   : > { %p592_p4 = pneg %p869_p3  ;;  %s814_s6 = smov 4  }
   0xd   : > { %s522_s7 = sadd.s32 4294967294, %s809_s18   ;;  %s883_s8 = sadd.s32 1, %s809_s18  }
   0xe   : > { %p593_p6 = pnand %p592_p4, %p43_p1  ;;  %s26_s9 = ssub.s32 %s809_s18, %s883_s8 }
   0xf   : > { %s29_s10 = sadd.s32 1, %s805_s17  ;;  %p27_p7 = scmp.eq.s32.totalorder %s26_s9, 0 }
  0x10   : > { %595 = dma.hbm_to_vmem [thread:$0]  (!%p593_p6), %s159_s21, 1024, %s161_s25, [#allocation6], %s813_s5, %s813_s5, %s814_s6  }
  0x11   : > { %598 = dma.hbm_to_vmem [thread:$0]  (!%p593_p6), %s174_s28, 128, %s176_s30, [#allocation6]  }
  0x12   : > { %p36_p8 = scmp.ne.s32.totalorder %s805_s17, %s801_s16  ;;  %p37_p9 = scmp.eq.s32.totalorder %s809_s18, 0 }
  0x13   : > { %p42_p10 = scmp.ne.s32.totalorder %s801_s16, %s797_s15  ;;  %p108_p13 = scmp.eq.s32.totalorder %s864_s22, 1 }
  0x14   : > { %s894_s11 = scalar_select %p27_p7, %s805_s17, %s29_s10  }
  0x15   : > { %p896_p11 = por %p37_p9, %p36_p8  ;;  %p902_p12 = por %p43_p1, %p42_p10 }
  0x16   : > { %p114_p0 = scmp.eq.s32.totalorder %s522_s7, 1  ;;  %p609_p2 = scmp.lt.s32.totalorder %s809_s18, 2 }
  0x17   : > { %s186_s14 = sand.u32 1, %s805_s17   ;;  %p909_p4 = por %p108_p13, %p36_p8 }
  0x18   : > { %p913_p6 = por %p114_p0, %p42_p10  ;;  %s527_s21 = sshll.u32 %s186_s14, 3 }
  0x19   : > { %s528_s24 = sshll.u32 %s809_s18, 3  ;;  %s190_s28 = scalar_lea.vmem [#allocation2], %s527_s21 }
  0x1a   : > { %s194_s27 = scalar_lea.hbm %s994_s0, %s528_s24  ;;  %s198_s29 = sshll.u32 %s190_s28, 4  ;;  %s199_s29 = int_to_ptr.vmem [resolvable:$true] %s198_s29 }
  0x1b   : > { %s196_s30 = sshll.u32 %s194_s27, 4  ;;  %p923_p7 = pnand %p609_p2, %p896_p11  ;;  %s197_s30 = int_to_ptr.hbm [resolvable:$true] %s196_s30 }
  0x1c   : > { %s187_s6 = scalar_lea.sflag [#allocation3], %s186_s14  ;;  %s709_s7 = sshra.s32 %s197_s30, 4  ;;  %s710_s7 = int_to_ptr.hbm [resolvable:$true] %s709_s7 }
  0x1d   : > { %s711_s9 = scalar_lea.hbm %s710_s7, 8  ;;  %p713_p9 = pneg %p923_p7 }
  0x1e   : > { %p712_p8 = scmp.ne.s32.totalorder %s710_s7, %s711_s9  ;;  %s716_s24 = scalar_lea.hbm %s994_s0, 16 }
  0x1f   : > { %p717_p11 = scmp.lt.s32.totalorder %s710_s7, %s994_s0  ;;  %p718_p0 = scmp.lt.s32.totalorder %s716_s24, %s711_s9 }
  0x20   : > { %p714_p10 = pnand %p713_p9, %p712_p8 }
  0x21   : > { %p719_p2 = por %p718_p0, %p717_p11 }
  0x22   : > { %p715_p13 = pneg %p714_p10 }
  0x24   : > { %p720_p5 = pnand %p719_p2, %p715_p13 }
  0x26   : > { %723 = shalt.err (!%p720_p5)
}
  0x27   : > { %602 = dma.hbm_to_vmem [thread:$0]  (!%p923_p7), %s197_s30, 128, %s199_s29, %s187_s6  }
  0x28   : > { %207 = sbr.rel (%p869_p3) target bundleno = 343 (0x157), region = 32  ;;  %s940_s14 = sand.u32 (!%p869_p3), 1, %s801_s16  }
  0x29   : > { %s530_s26 = sshll.u32 (!%p869_p3), %s940_s14, 3  ;;  %s210_s27 = scalar_lea.sflag (!%p869_p3), [#allocation3], %s940_s14 }
  0x2a   : > { %s213_s28 = scalar_lea.vmem (!%p869_p3), [#allocation2], %s530_s26 }
  0x2d   : > { %784 = dma.done.wait (%p902_p12), %s210_s27, 128  }
  0x2e   : > { %786 = vsyncadd (%p902_p12), %s210_s27, 4294967168 }
  0x2f   : > { %788 = dma.done.wait (%p43_p1), [#allocation6], 1152  }
  0x30   : > { %790 = vsyncadd (%p43_p1), [#allocation6], 4294966144  ;;  %v579_v0 = vld [vmem:[#allocation5 + $0x38] sm:$0xff]  ;;  %v578_v1 = vld [vmem:[#allocation5 + $0x30] sm:$0xff]  ;;  %s569_s23 = sshll.u32 %s864_s22, 3  ;;  %s246_s5 = scalar_lea.vmem [#allocation8], %s530_s26 }
  0x31   : > { %334 = vmatpush.bf16.msra.mxu0 %v579_v0  ;;  %347 = vmatpush.bf16.msra.mxu1 %v579_v0  ;;  %v257_v2 = vld [vmem:[%s213_s28] sm:$0xff]  ;;  %v258_v3 = vld [vmem:[#allocation7] sm:$0xff]  ;;  %v577_v6 = vld [vmem:[#allocation5 + $0x28] sm:$0xff]  ;;  %s401_s30 = scalar_lea.hbm %s997_s3, %s569_s23  ;;  %s403_s6 = sshll.u32 %s246_s5, 4  ;;  %s404_s6 = int_to_ptr.vmem [resolvable:$true] %s403_s6 }
  0x32   : > { %360 = vmatpush.bf16.msra.mxu2 %v579_v0  ;;  %v259_v4 = vperm.slane %v258_v3, 0  ;;  %v261_v5 = vperm.slane %v258_v3, 1  ;;  %v576_v9 = vld [vmem:[#allocation5 + $0x20] sm:$0xff]  ;;  %v575_v12 = vld [vmem:[#allocation5 + $0x18] sm:$0xff]  ;;  %v574_v14 = vld [vmem:[#allocation5 + $0x10] sm:$0xff]  ;;  %v374_v24 = vperm.slane %v258_v3, 2 }
  0x33   : > { %v573_v16 = vld [vmem:[#allocation5 + $0x8] sm:$0xff]  ;;  %v572_v18 = vld [vmem:[#allocation5] sm:$0xff]  ;;  %v376_v29 = vperm.slane %v258_v3, 3  ;;  %s405_s7 = sshll.u32 %s401_s30, 4  ;;  %s387_s9 = scalar_lea.sflag [#allocation4], %s940_s14  ;;  %s406_s7 = int_to_ptr.hbm [resolvable:$true] %s405_s7 }
  0x34   : > { %v260_v7 = vmul.f32 %v259_v4, %v257_v2  ;;  %s753_s10 = sshra.s32 %s406_s7, 4  ;;  %s759_s12 = scalar_lea.hbm %s997_s3, 16  ;;  %s754_s10 = int_to_ptr.hbm [resolvable:$true] %s753_s10 }
  0x35   : > { %335 = vmatpush.bf16.msra.mxu0 %v578_v1  ;;  %348 = vmatpush.bf16.msra.mxu1 %v578_v1  ;;  %s755_s21 = scalar_lea.hbm %s754_s10, 8  ;;  %p760_p12 = scmp.lt.s32.totalorder %s754_s10, %s997_s3 }
  0x36   : > { %361 = vmatpush.bf16.msra.mxu2 %v578_v1  ;;  %v262_v8 = vadd.f32 %v261_v5, %v260_v7  ;;  %p756_p1 = scmp.ne.s32.totalorder %s754_s10, %s755_s21  ;;  %p761_p7 = scmp.lt.s32.totalorder %s759_s12, %s755_s21 }
  0x38   : > { %v279_v10 = vpack.c.bf16 %v262_v8, %v262_v8  ;;  %p757_p3 = pnand %p756_p1, %p909_p4  ;;  %p762_p8 = por %p761_p7, %p760_p12 }
  0x39   : > { %336 = vmatpush.bf16.msra.mxu0 %v577_v6  ;;  %349 = vmatpush.bf16.msra.mxu1 %v577_v6 }
  0x3a   : > { %362 = vmatpush.bf16.msra.mxu2 %v577_v6  ;;  %v280_v11 = vunpack.c.l.bf16 %v279_v10  ;;  %p758_p5 = pneg %p757_p3 }
  0x3c   : > { %v281_v13 = vsub.f32 %v262_v8, %v280_v11  ;;  %p763_p9 = pnand %p762_p8, %p758_p5 }
  0x3d   : > { %337 = vmatpush.bf16.msra.mxu0 %v576_v9  ;;  %350 = vmatpush.bf16.msra.mxu1 %v576_v9 }
  0x3e   : > { %363 = vmatpush.bf16.msra.mxu2 %v576_v9  ;;  %v282_v15 = vpack.c.bf16 %v281_v13, %v281_v13 }
  0x40   : > { %v283_v17 = vunpack.c.l.bf16 %v282_v15 }
  0x41   : > { %338 = vmatpush.bf16.msra.mxu0 %v575_v12  ;;  %351 = vmatpush.bf16.msra.mxu1 %v575_v12 }
  0x42   : > { %364 = vmatpush.bf16.msra.mxu2 %v575_v12  ;;  %v284_v19 = vsub.f32 %v281_v13, %v283_v17 }
  0x44   : > { %v285_v20 = vpack.c.bf16 %v284_v19, %v284_v19 }
  0x45   : > { %339 = vmatpush.bf16.msra.mxu0 %v574_v14  ;;  %352 = vmatpush.bf16.msra.mxu1 %v574_v14 }
  0x46   : > { %365 = vmatpush.bf16.msra.mxu2 %v574_v14 }
  0x49   : > { %340 = vmatpush.bf16.msra.mxu0 %v573_v16  ;;  %353 = vmatpush.bf16.msra.mxu1 %v573_v16 }
  0x4a   : > { %366 = vmatpush.bf16.msra.mxu2 %v573_v16 }
  0x4d   : > { %341 = vmatpush.bf16.msra.mxu0 %v572_v18  ;;  %354 = vmatpush.bf16.msra.mxu1 %v572_v18 }
  0x4e   : > { %367 = vmatpush.bf16.msra.mxu2 %v572_v18 }
  0x50   : > { %342 = vmatmul.bf16.vlgmr.msra.gmra.mxu0 %v282_v15  ;;  %355 = vmatmul.bf16.vlgmr.msra.gmra.mxu1 %v279_v10 }
  0x51   : > { %368 = vmatmul.bf16.vlgmr.msra.gmra.mxu2 %v285_v20 }
  0xcd   : > { %v343_v21 = vpop.f32.mrf.mxu0  ;;  %v356_v22 = vpop.f32.mrf.mxu1 }
  0xce   : > { %v357_v23 = vadd.f32 %v356_v22, %v343_v21 }
  0xd4   : > { %v369_v25 = vpop.f32.mrf.mxu2 }
  0xd5   : > { %v373_v26 = vadd.f32 %v369_v25, %v357_v23  ;;  %v345_v27 = vpop.f32.mrf.mxu0  ;;  %v358_v28 = vpop.f32.mrf.mxu1 }
  0xd7   : > { %v375_v30 = vmul.f32 %v374_v24, %v373_v26 }
  0xd9   : > { %v377_v31 = vadd.f32 %v376_v29, %v375_v30 }
  0xdb   : > { %v379_v32 = vmul.f32 %v377_v31, %v377_v31  ;;  %378 = vst [vmem:[%s246_s5] sm:$0xff] %v377_v31 }
  0xdc   : > { %v371_v33 = vpop.f32.mrf.mxu2 }
  0xdd   : > { %766 = shalt.err (!%p763_p9)
}
  0xde   : > { %590 = dma.vmem_to_hbm [thread:$0]  (%p909_p4), %s404_s6, 128, %s406_s7, %s387_s9   ;;  %380 = vadd.xlane.f32.xlu0 %v379_v32  ;;  %vm384_vm0 = vcmask 7168  }
  0xdf   : > { %p253_p10 = scmp.lt.s32.totalorder %s864_s22, 1 }
  0xe1   : > { %s1011_s22 = smov (!%p253_p10, %s864_s22), 1 }
  0xe2   : > { %s534_s14 = sshll.u32 %s1011_s22, 3 }
  0xe3   : > { %s256_s13 = scalar_lea.vmem %s998_s4, %s534_s14 }
 0x151   : > { %v381_v34 = vpop.xlane.xlu0 %380 }
 0x152   : > { %v382_v35 = vmul.f32 -0.5, %v381_v34 }
 0x154   : > { %v567_v36 = vadd.f32 -117.62413, %v382_v35 }
 0x156   : > { %385 = vst.msk [vmem:[%s256_s13] sm:$0xff] %vm384_vm0, %v567_v36 }
 0x157 PF: > { %s420_s19 = sand.u32 1, %s797_s15   ;;  %p1005_p4 = scmp.ge.s32.totalorder %s809_s18, 2 }
 0x158   : > { %s421_s29 = scalar_lea.sflag [#allocation4], %s420_s19 }
 0x159   : > { %p604_p13 = pnand %p1005_p4, %p913_p6 }
 0x15b   : > { %p605_p11 = pneg %p604_p13 }
 0x15d   : > { %792 = dma.done.wait (%p605_p11), %s421_s29, 128  }
 0x15e   : > { %794 = vsyncadd (%p605_p11), %s421_s29, 4294967168  ;;  %p19_p0 = scmp.ge.s32.totalorder %s883_s8, 4   ;;  %s1006_s15 = smov %s801_s16 }
 0x15f   : > { %s1007_s16 = smov %s805_s17  ;;  %s1008_s17 = smov %s894_s11 }
 0x160   : > { %s1009_s18 = smov %s883_s8  ;;  %21 = sbr.rel (!%p19_p0) target bundleno = 6 (0x6), region = 97 }
 0x165   :  { %434 = vsyncpa [#allocation3], 1 }
 0x166   :  { %436 = vsyncpa [#allocation3 + $0x1], 1 }
 0x167   :  { %437 = vsyncpa [#allocation6], 1 }
 0x168   :  { %438 = vsyncpa [#allocation4], 1 }
 0x169   :  { %440 = vsyncpa [#allocation4 + $0x1], 1 }

</bundles_post_ra>
